<compile_context>
chip_gen: v7x
topology: tpu7x:2x2x1
jax: 0.10.0
libtpu: 0.0.40
codegen_flags: <defaults>
</compile_context>

<pallas_src>
import functools

import jax
import jax.numpy as jnp
from jax import lax
from jax.experimental import pallas as pl
from jax.experimental.pallas import tpu as pltpu


def _contrastive_rows(q, a1, a2, t0, t1, inv_temperature):
    """Per-row contrastive math. Inputs (tm, D); returns loss (tm,1) f32, eq (tm,1) bool."""
    q = q.astype(jnp.float32)
    a1 = a1.astype(jnp.float32)
    a2 = a2.astype(jnp.float32)

    # F.normalize(v, dim=1) == v / max(||v||, 1e-12); folded into the dot
    # products via rsqrt(max(sumsq, 1e-24)) -> no full-width (tm, D) divides.
    eps_sq = 1e-24
    inv_nq = lax.rsqrt(jnp.maximum(jnp.sum(q * q, axis=1, keepdims=True), eps_sq))
    inv_na1 = lax.rsqrt(jnp.maximum(jnp.sum(a1 * a1, axis=1, keepdims=True), eps_sq))
    inv_na2 = lax.rsqrt(jnp.maximum(jnp.sum(a2 * a2, axis=1, keepdims=True), eps_sq))

    # sum(eye(B) * (Q @ A^T), -1) == row-wise dot products (the diagonal).
    qa = jnp.sum(q * a1, axis=1, keepdims=True) * inv_nq * inv_na1 * inv_temperature
    qc = jnp.sum(q * a2, axis=1, keepdims=True) * inv_nq * inv_na2 * inv_temperature

    # torch.logical_not(target).float(): nonzero -> 0.0, zero -> 1.0
    nt0 = jnp.where(t0 == 0.0, 1.0, 0.0)
    nt1 = jnp.where(t1 == 0.0, 1.0, 0.0)

    e_qa = jnp.exp(qa)   # |qa| <= 1/T, so no max-subtraction needed
    e_qc = jnp.exp(qc)

    eps = 1e-8
    up = jnp.maximum(nt0 * e_qa + nt1 * e_qc, eps)     # clamp(up, eps, +inf)
    down = jnp.maximum(t0 * e_qa + t1 * e_qc, eps)     # clamp(down, eps, +inf)
    loss = jnp.log(up) - jnp.log(down)                 # (tm, 1)

    eq = (qa > qc).astype(jnp.float32) == t0           # (tm, 1) bool
    return loss, eq


def _store_outputs(loss, eq, loss_ref, eq_ref, batch_size, block_rows):
    pid = pl.program_id(0)
    # Mask rows past the true batch size (last tile may be padded). Select, not
    # multiply, so NaN/garbage in pad rows cannot leak into the sum.
    row = pid * block_rows + lax.broadcasted_iota(jnp.int32, (block_rows, 1), 0)
    valid = row < batch_size
    loss_sum = jnp.sum(jnp.where(valid, loss, 0.0))
    # Lane-dense single-vreg store; wrapper reads [i, 0, 0].
    loss_ref[...] = jnp.broadcast_to(loss_sum, (1, 8, 128)).astype(jnp.float32)
    eq_ref[...] = eq.astype(jnp.int32)   # padded rows clipped by partial writeback


def _split_kernel(tgt_ref, q_ref, a1_ref, a2_ref, loss_ref, eq_ref, *,
                  inv_temperature, batch_size, block_rows):
    # tgt_ref : SMEM (2,) f32; q/a1/a2_ref : VMEM (tm, D); loss_ref : (1,8,128); eq_ref : (tm,1)
    t0 = tgt_ref[0]
    t1 = tgt_ref[1]
    loss, eq = _contrastive_rows(q_ref[...], a1_ref[...], a2_ref[...],
                                 t0, t1, inv_temperature)
    _store_outputs(loss, eq, loss_ref, eq_ref, batch_size, block_rows)


def _fused_kernel(tgt_ref, x_ref, loss_ref, eq_ref, *,
                  d, inv_temperature, batch_size, block_rows):
    # Fallback when D is not a multiple of 128: single (tm, 4*D) block,
    # lane-sliced in kernel. Row i = [q_i | a1_i | (unused) | a2_i].
    t0 = tgt_ref[0]
    t1 = tgt_ref[1]
    q = x_ref[:, 0 * d:1 * d]
    a1 = x_ref[:, 1 * d:2 * d]
    a2 = x_ref[:, 3 * d:4 * d]
    loss, eq = _contrastive_rows(q, a1, a2, t0, t1, inv_temperature)
    _store_outputs(loss, eq, loss_ref, eq_ref, batch_size, block_rows)


def _pick_block_rows(batch_size, d, itemsize, n_slabs, requested):
    b_padded = -(-batch_size // 8) * 8
    if requested is not None:
        tm = requested
    else:
        # ~8 MiB of input blocks per grid step: double-buffered ~16 MiB, which
        # stays under the 32 MiB scoped limit and v7x's 64 MiB physical VMEM.
        budget = 8 * 1024 * 1024
        tm = max(8, budget // (n_slabs * d * itemsize))
        # v7x megacore: ensure >= 2 (balanced) grid tiles whenever possible so
        # dimension_semantics=("parallel",) can shard across both TensorCores.
        if b_padded >= 16:
            half = -(-b_padded // 16) * 8      # ceil(b_padded/2), 8-row aligned
            tm = min(tm, half)
    tm = min(tm, b_padded)
    tm = max(8, (tm // 8) * 8)                 # sublane (8) alignment
    return tm


def custom_loss_forward(x, target, temperature=0.7, block_rows=None):
    """JAX/Pallas equivalent of custom_loss.forward(x, target)."""
    d = x.shape[-1]
    # Same memory view as torch's x.reshape(-1, 2, 2, D):
    # row i of (B, 4*D) = [q_i | a1_i | a21_i (unused) | a2_i]
    x2 = x.reshape(-1, 4 * d)
    batch_size = x2.shape[0]
    itemsize = jnp.dtype(x.dtype).itemsize

    # Split path skips the unused a21 slab (25% less HBM traffic); needs D%128==0
    # so each (tm, D) lane block is layout-legal.
    split = (d % 128 == 0)
    n_slabs = 3 if split else 4

    tm = _pick_block_rows(batch_size, d, itemsize, n_slabs, block_rows)
    num_tiles = -(-batch_size // tm)

    target_f = target.astype(jnp.float32)
    inv_temperature = 1.0 / float(temperature)

    out_shape = (
        jax.ShapeDtypeStruct((num_tiles, 8, 128), jnp.float32),   # partial loss sums
        jax.ShapeDtypeStruct((batch_size, 1), jnp.int32),         # eq per row
    )
    out_specs = (
        pl.BlockSpec((1, 8, 128), lambda i: (i, 0, 0)),
        pl.BlockSpec((tm, 1), lambda i: (i, 0)),
    )
    cost = pl.CostEstimate(
        flops=int(10 * batch_size * d),
        transcendentals=int(5 * batch_size),
        bytes_accessed=int(n_slabs * batch_size * d * itemsize
                           + batch_size * 4 + num_tiles * 8 * 128 * 4 + 8),
    )
    compiler_params = pltpu.CompilerParams(
        dimension_semantics=("parallel",),        # shard tiles across TCs (v7x)
        vmem_limit_bytes=32 * 1024 * 1024,
    )

    if split:
        kernel = functools.partial(
            _split_kernel, inv_temperature=inv_temperature,
            batch_size=batch_size, block_rows=tm)
        in_specs = [
            pl.BlockSpec(memory_space=pltpu.MemorySpace.SMEM),   # target (2,)
            pl.BlockSpec((tm, d), lambda i: (i, 0)),             # q   = [0:D]
            pl.BlockSpec((tm, d), lambda i: (i, 1)),             # a1  = [D:2D]
            pl.BlockSpec((tm, d), lambda i: (i, 3)),             # a2  = [3D:4D]
        ]
        args = (target_f, x2, x2, x2)
    else:
        kernel = functools.partial(
            _fused_kernel, d=d, inv_temperature=inv_temperature,
            batch_size=batch_size, block_rows=tm)
        in_specs = [
            pl.BlockSpec(memory_space=pltpu.MemorySpace.SMEM),   # target (2,)
            pl.BlockSpec((tm, 4 * d), lambda i: (i, 0)),         # full rows
        ]
        args = (target_f, x2)

    partial_loss, eq = pl.pallas_call(
        kernel,
        out_shape=out_shape,
        grid_spec=pltpu.PrefetchScalarGridSpec(
            num_scalar_prefetch=0,
            grid=(num_tiles,),
            in_specs=in_specs,
            out_specs=out_specs,
        ),
        compiler_params=compiler_params,
        cost_estimate=cost,
    )(*args)

    loss = jnp.sum(partial_loss[:, 0, 0]) / batch_size   # divide by TRUE batch size
    return loss, eq[:, 0].astype(jnp.bool_)


def _reference(x, target, temperature=0.7):
    # Pure-JAX reference mirroring the PyTorch module.
    d = x.shape[-1]
    x4 = x.astype(jnp.float32).reshape(-1, 2, 2, d)
    b = x4.shape[0]
    q = x4[:, 0, 0, :]
    a1 = x4[:, 0, 1, :]
    a2 = x4[:, 1, 1, :]

    def norm(v):
        return v / jnp.maximum(jnp.linalg.norm(v, axis=1, keepdims=True), 1e-12)

    qn, a1n, a2n = norm(q), norm(a1), norm(a2)
    mask = jnp.eye(b)
    qa = jnp.sum(mask * (qn @ a1n.T), axis=-1) / temperature
    qc = jnp.sum(mask * (qn @ a2n.T), axis=-1) / temperature
    t = target.astype(jnp.float32)
    nt = (t == 0.0).astype(jnp.float32)
    up = nt[0] * jnp.exp(qa) + nt[1] * jnp.exp(qc)
    down = t[0] * jnp.exp(qa) + t[1] * jnp.exp(qc)
    loss = jnp.log(jnp.maximum(up, 1e-8)) - jnp.log(jnp.maximum(down, 1e-8))
    correct = (qa > qc).astype(jnp.int32)
    return loss.mean(), correct == t[0].astype(jnp.int32)


if __name__ == "__main__":
    key = jax.random.PRNGKey(0)
    B, D = 20, 128                       # x has 4*B rows of D features
    x = jax.random.normal(key, (4 * B, D), dtype=jnp.float32)
    target = jnp.array([1.0, 0.0], dtype=jnp.float32)

    ref_loss, ref_eq = _reference(x, target, temperature=0.7)

    # Default path: auto tm=16 -> 2 tiles (megacore-friendly, last tile padded);
    # forced block_rows=8 -> 3 tiles to further exercise masking / writeback clip.
    for br in (None, 8):
        loss, eq = custom_loss_forward(x, target, temperature=0.7, block_rows=br)
        loss = jax.block_until_ready(loss)
        eq = jax.block_until_ready(eq)
        assert jnp.allclose(loss, ref_loss, atol=1e-4, rtol=1e-5), (br, loss, ref_loss)
        assert bool(jnp.all(eq == ref_eq)), (br, eq, ref_eq)

    # bf16 inputs: HBM read bytes halved; kernel still accumulates in f32.
    x_bf16 = x.astype(jnp.bfloat16)
    ref_loss_bf, ref_eq_bf = _reference(x_bf16, target, temperature=0.7)
    loss_bf, eq_bf = custom_loss_forward(x_bf16, target, temperature=0.7)
    loss_bf = jax.block_until_ready(loss_bf)
    eq_bf = jax.block_until_ready(eq_bf)
    assert jnp.allclose(loss_bf, ref_loss_bf, atol=1e-4, rtol=1e-4), (loss_bf, ref_loss_bf)
    assert bool(jnp.all(eq_bf == ref_eq_bf))

    print("KERNEL_OK")
</pallas_src>

<mosaic_0001>
module attributes {stable_mosaic.version = 11 : i64} {
  func.func @_split_kernel(%arg0: i32, %arg1: memref<2xf32, #tpu.memory_space<smem>>, %arg2: memref<16x128xf32, #tpu.memory_space<vmem>>, %arg3: memref<16x128xf32, #tpu.memory_space<vmem>>, %arg4: memref<16x128xf32, #tpu.memory_space<vmem>>, %arg5: memref<1x8x128xf32, #tpu.memory_space<vmem>>, %arg6: memref<16x1xi32, #tpu.memory_space<vmem>>) attributes {dimension_semantics = [#tpu.dimension_semantics<parallel>], iteration_bounds = array<i64: 2>, scalar_prefetch = 0 : i64, scratch_operands = 0 : i64, tpu.core_type = #tpu.core_type<tc>, window_params = [{transform_indices = @transform_0, window_bounds = array<i64: 2>}, {transform_indices = @transform_1, window_bounds = array<i64: 16, 128>}, {transform_indices = @transform_2, window_bounds = array<i64: 16, 128>}, {transform_indices = @transform_3, window_bounds = array<i64: 16, 128>}, {transform_indices = @transform_4, window_bounds = array<i64: 1, 8, 128>}, {transform_indices = @transform_5, window_bounds = array<i64: 16, 1>}]} {
    %c0 = arith.constant 0 : index
    %0 = memref.load %arg1[%c0] : memref<2xf32, #tpu.memory_space<smem>>
    %c1 = arith.constant 1 : index
    %1 = memref.load %arg1[%c1] : memref<2xf32, #tpu.memory_space<smem>>
    %c0_0 = arith.constant 0 : index
    %c0_1 = arith.constant 0 : index
    %2 = vector.load %arg2[%c0_0, %c0_1] : memref<16x128xf32, #tpu.memory_space<vmem>>, vector<16x128xf32>
    %c0_2 = arith.constant 0 : index
    %c0_3 = arith.constant 0 : index
    %3 = vector.load %arg3[%c0_2, %c0_3] : memref<16x128xf32, #tpu.memory_space<vmem>>, vector<16x128xf32>
    %c0_4 = arith.constant 0 : index
    %c0_5 = arith.constant 0 : index
    %4 = vector.load %arg4[%c0_4, %c0_5] : memref<16x128xf32, #tpu.memory_space<vmem>>, vector<16x128xf32>
    %5 = arith.mulf %2, %2 : vector<16x128xf32>
    %cst = arith.constant dense<0.000000e+00> : vector<16xf32>
    %6 = vector.multi_reduction <add>, %5, %cst [1] : vector<16x128xf32> to vector<16xf32>
    %7 = vector.shape_cast %6 : vector<16xf32> to vector<16x1xf32>
    %cst_6 = arith.constant 1.000000e-24 : f32
    %8 = vector.broadcast %cst_6 : f32 to vector<16x1xf32>
    %9 = arith.maximumf %7, %8 : vector<16x1xf32>
    %10 = math.rsqrt %9 : vector<16x1xf32>
    %11 = arith.mulf %3, %3 : vector<16x128xf32>
    %cst_7 = arith.constant dense<0.000000e+00> : vector<16xf32>
    %12 = vector.multi_reduction <add>, %11, %cst_7 [1] : vector<16x128xf32> to vector<16xf32>
    %13 = vector.shape_cast %12 : vector<16xf32> to vector<16x1xf32>
    %cst_8 = arith.constant 1.000000e-24 : f32
    %14 = vector.broadcast %cst_8 : f32 to vector<16x1xf32>
    %15 = arith.maximumf %13, %14 : vector<16x1xf32>
    %16 = math.rsqrt %15 : vector<16x1xf32>
    %17 = arith.mulf %4, %4 : vector<16x128xf32>
    %cst_9 = arith.constant dense<0.000000e+00> : vector<16xf32>
    %18 = vector.multi_reduction <add>, %17, %cst_9 [1] : vector<16x128xf32> to vector<16xf32>
    %19 = vector.shape_cast %18 : vector<16xf32> to vector<16x1xf32>
    %cst_10 = arith.constant 1.000000e-24 : f32
    %20 = vector.broadcast %cst_10 : f32 to vector<16x1xf32>
    %21 = arith.maximumf %19, %20 : vector<16x1xf32>
    %22 = math.rsqrt %21 : vector<16x1xf32>
    %23 = arith.mulf %2, %3 : vector<16x128xf32>
    %cst_11 = arith.constant dense<0.000000e+00> : vector<16xf32>
    %24 = vector.multi_reduction <add>, %23, %cst_11 [1] : vector<16x128xf32> to vector<16xf32>
    %25 = vector.shape_cast %24 : vector<16xf32> to vector<16x1xf32>
    %26 = arith.mulf %25, %10 : vector<16x1xf32>
    %27 = arith.mulf %26, %16 : vector<16x1xf32>
    %cst_12 = arith.constant 1.42857146 : f32
    %28 = vector.broadcast %cst_12 : f32 to vector<16x1xf32>
    %29 = arith.mulf %27, %28 : vector<16x1xf32>
    %30 = arith.mulf %2, %4 : vector<16x128xf32>
    %cst_13 = arith.constant dense<0.000000e+00> : vector<16xf32>
    %31 = vector.multi_reduction <add>, %30, %cst_13 [1] : vector<16x128xf32> to vector<16xf32>
    %32 = vector.shape_cast %31 : vector<16xf32> to vector<16x1xf32>
    %33 = arith.mulf %32, %10 : vector<16x1xf32>
    %34 = arith.mulf %33, %22 : vector<16x1xf32>
    %cst_14 = arith.constant 1.42857146 : f32
    %35 = vector.broadcast %cst_14 : f32 to vector<16x1xf32>
    %36 = arith.mulf %34, %35 : vector<16x1xf32>
    %cst_15 = arith.constant 0.000000e+00 : f32
    %37 = arith.cmpf oeq, %0, %cst_15 : f32
    %cst_16 = arith.constant 1.000000e+00 : f32
    %cst_17 = arith.constant 0.000000e+00 : f32
    %38 = arith.select %37, %cst_16, %cst_17 : f32
    %cst_18 = arith.constant 0.000000e+00 : f32
    %39 = arith.cmpf oeq, %1, %cst_18 : f32
    %cst_19 = arith.constant 1.000000e+00 : f32
    %cst_20 = arith.constant 0.000000e+00 : f32
    %40 = arith.select %39, %cst_19, %cst_20 : f32
    %41 = math.exp %29 : vector<16x1xf32>
    %42 = math.exp %36 : vector<16x1xf32>
    %43 = vector.broadcast %38 : f32 to vector<16x1xf32>
    %44 = arith.mulf %43, %41 : vector<16x1xf32>
    %45 = vector.broadcast %40 : f32 to vector<16x1xf32>
    %46 = arith.mulf %45, %42 : vector<16x1xf32>
    %47 = arith.addf %44, %46 : vector<16x1xf32>
    %cst_21 = arith.constant 9.99999993E-9 : f32
    %48 = vector.broadcast %cst_21 : f32 to vector<16x1xf32>
    %49 = arith.maximumf %47, %48 : vector<16x1xf32>
    %50 = vector.broadcast %0 : f32 to vector<16x1xf32>
    %51 = arith.mulf %50, %41 : vector<16x1xf32>
    %52 = vector.broadcast %1 : f32 to vector<16x1xf32>
    %53 = arith.mulf %52, %42 : vector<16x1xf32>
    %54 = arith.addf %51, %53 : vector<16x1xf32>
    %cst_22 = arith.constant 9.99999993E-9 : f32
    %55 = vector.broadcast %cst_22 : f32 to vector<16x1xf32>
    %56 = arith.maximumf %54, %55 : vector<16x1xf32>
    %57 = math.log %49 : vector<16x1xf32>
    %58 = math.log %56 : vector<16x1xf32>
    %59 = arith.subf %57, %58 : vector<16x1xf32>
    %60 = arith.cmpf ogt, %29, %36 : vector<16x1xf32>
    %61 = arith.extui %60 : vector<16x1xi1> to vector<16x1xi32>
    %62 = arith.sitofp %61 : vector<16x1xi32> to vector<16x1xf32>
    %63 = vector.broadcast %0 : f32 to vector<16x1xf32>
    %64 = arith.cmpf oeq, %62, %63 : vector<16x1xf32>
    %c16_i32 = arith.constant 16 : i32
    %65 = arith.muli %arg0, %c16_i32 : i32
    %66 = tpu.iota {dimensions = array<i32: 0>} : vector<16x1xi32>
    %67 = vector.broadcast %65 : i32 to vector<16x1xi32>
    %68 = arith.addi %67, %66 : vector<16x1xi32>
    %c20_i32 = arith.constant 20 : i32
    %69 = vector.broadcast %c20_i32 : i32 to vector<16x1xi32>
    %70 = arith.cmpi slt, %68, %69 : vector<16x1xi32>
    %cst_23 = arith.constant 0.000000e+00 : f32
    %71 = vector.broadcast %cst_23 : f32 to vector<16x1xf32>
    %72 = arith.select %70, %59, %71 : vector<16x1xi1>, vector<16x1xf32>
    %73 = vector.shape_cast %72 : vector<16x1xf32> to vector<1x16x1xf32>
    %cst_24 = arith.constant dense<0.000000e+00> : vector<1xf32>
    %74 = vector.multi_reduction <add>, %73, %cst_24 [1, 2] : vector<1x16x1xf32> to vector<1xf32>
    %75 = vector.shape_cast %74 : vector<1xf32> to vector<1x1x1xf32>
    %76 = vector.extract %75[0, 0, 0] : f32 from vector<1x1x1xf32>
    %77 = vector.broadcast %76 : f32 to vector<1x8x128xf32>
    %c0_25 = arith.constant 0 : index
    %c0_26 = arith.constant 0 : index
    %c0_27 = arith.constant 0 : index
    %78 = vector.load %arg5[%c0_25, %c0_26, %c0_27] : memref<1x8x128xf32, #tpu.memory_space<vmem>>, vector<1x8x128xf32>
    tpu.vector_store %arg5[%c0_25, %c0_26, %c0_27], %77 {strides = array<i32>} : memref<1x8x128xf32, #tpu.memory_space<vmem>>, vector<1x8x128xf32>,
    %79 = arith.extui %64 : vector<16x1xi1> to vector<16x1xi32>
    %c0_28 = arith.constant 0 : index
    %c0_29 = arith.constant 0 : index
    %80 = vector.load %arg6[%c0_28, %c0_29] : memref<16x1xi32, #tpu.memory_space<vmem>>, vector<16x1xi32>
    tpu.vector_store %arg6[%c0_28, %c0_29], %79 {strides = array<i32>} : memref<16x1xi32, #tpu.memory_space<vmem>>, vector<16x1xi32>,
    return
  }
  func.func @transform_0(%arg0: i32) -> i32 {
    %c0_i32 = arith.constant 0 : i32
    %c0_i32_0 = arith.constant 0 : i32
    return %c0_i32 : i32
  }
  func.func @transform_1(%arg0: i32) -> (i32, i32) {
    %c0_i32 = arith.constant 0 : i32
    %c0_i32_0 = arith.constant 0 : i32
    return %arg0, %c0_i32 : i32, i32
  }
  func.func @transform_2(%arg0: i32) -> (i32, i32) {
    %c1_i32 = arith.constant 1 : i32
    %c0_i32 = arith.constant 0 : i32
    return %arg0, %c1_i32 : i32, i32
  }
  func.func @transform_3(%arg0: i32) -> (i32, i32) {
    %c3_i32 = arith.constant 3 : i32
    %c0_i32 = arith.constant 0 : i32
    return %arg0, %c3_i32 : i32, i32
  }
  func.func @transform_4(%arg0: i32) -> (i32, i32, i32) {
    %c0_i32 = arith.constant 0 : i32
    %c0_i32_0 = arith.constant 0 : i32
    %c0_i32_1 = arith.constant 0 : i32
    return %arg0, %c0_i32, %c0_i32_0 : i32, i32, i32
  }
  func.func @transform_5(%arg0: i32) -> (i32, i32) {
    %c0_i32 = arith.constant 0 : i32
    %c0_i32_0 = arith.constant 0 : i32
    return %arg0, %c0_i32 : i32, i32
  }
}

</mosaic_0001>

<bundles_post_ra>
// kernel: tpu_custom_call.1
= control target key start
LH: loop header
LB: loop body
LE: loop exit
PB: predicated region body
PF: predicated region fallthrough
CT: control target
= control target key end

     0   :  { %s1714_s0 = inlined_call_operand.hbm [shape: f32[2], index: 0, kind: input, shape index: {}]   ;;  %s1715_s1 = inlined_call_operand.hbm [shape: f32[20,512], index: 1, kind: input, shape index: {}]   ;;  %s1716_s2 = inlined_call_operand.hbm [shape: f32[20,512], index: 2, kind: input, shape index: {}]   ;;  %s1717_s3 = inlined_call_operand.hbm [shape: f32[20,512], index: 3, kind: input, shape index: {}]   ;;  %s1718_s4 = inlined_call_operand.hbm [shape: f32[2,8,128], index: 4, kind: output, shape index: {0}]   ;;  %s1719_s5 = inlined_call_operand.vmem [shape: s32[20,1], index: 5, kind: output, shape index: {1}]  }
   0x1   :  { %1724 = sst [smem:[#allocation16_spill]] %s1714_s0 }
   0x2   :  { %1725 = sst [smem:[#allocation17_spill]] %s1715_s1 }
   0x3   :  { %11 = vsyncpa [#allocation5], 0 }
   0x4   :  { %12 = vsyncpa [#allocation3], 0 }
   0x5   :  { %14 = vsyncpa [#allocation3 + $0x1], 0 }
   0x6   :  { %15 = vsyncpa [#allocation8], 0 }
   0x7   :  { %17 = vsyncpa [#allocation8 + $0x1], 0 }
   0x8   :  { %18 = vsyncpa [#allocation4], 0 }
   0x9   :  { %20 = vsyncpa [#allocation4 + $0x1], 0  ;;  %s1373_s18 = smov 0   ;;  %s1375_s19 = smov 0  }
   0xa   :  { %s1377_s20 = smov 0   ;;  %s1379_s21 = smov 0  }
   0xb LB: > { %s1394_s22 = sadd.s32 4294967295, %s1293_s21   ;;  %s863_s23 = sadd.s32 4294967294, %s1293_s21   ;;  %s1293_s21 = sphi %s1379_s21, %s1742_s21   ;;  %s1289_s20 = sphi %s1377_s20, %s1741_s20   ;;  %s1285_s19 = sphi %s1375_s19, %s1740_s19   ;;  %s1281_s18 = sphi %s1373_s18, %s1739_s18  }
   0xc   : > { %s1398_s24 = sadd.s32 1, %s1293_s21   ;;  %s54_s25 = sadd.s32 1, %s1289_s20 }
   0xd   : > { %s51_s26 = ssub.s32 %s1293_s21, %s1398_s24  ;;  %p61_p0 = scmp.ne.s32.totalorder %s1289_s20, %s1285_s19 }
   0xe   : > { %p52_p1 = scmp.eq.s32.totalorder %s51_s26, 0  ;;  %p62_p2 = scmp.eq.s32.totalorder %s1293_s21, 0 }
   0xf   : > { %p67_p3 = scmp.ne.s32.totalorder %s1285_s19, %s1281_s18  ;;  %p1721_p4 = scmp.eq.s32.totalorder %s1394_s22, 0 }
  0x10   : > { %s1410_s27 = scalar_select %p52_p1, %s1289_s20, %s54_s25  }
  0x11   : > { %p1412_p5 = por %p62_p2, %p61_p0  ;;  %p1418_p6 = por %p1721_p4, %p67_p3 }
  0x12   : > { %p143_p7 = scmp.eq.s32.totalorder %s1394_s22, 1  ;;  %p149_p8 = scmp.eq.s32.totalorder %s863_s23, 1 }
  0x13   : > { %s1727_s29 = scalar_select %p1418_p6, 1, 0 }
  0x14   : > { %p864_p9 = scmp.ge.s32.totalorder %s1293_s21, 1  ;;  %p182_p10 = scmp.lt.s32.totalorder %s1293_s21, 3 }
  0x15   : > { %p1425_p11 = por %p143_p7, %p61_p0  ;;  %p1429_p12 = por %p149_p8, %p67_p3 }
  0x16   : > { %p1433_p13 = pnand %p864_p9, %p182_p10  ;;  %s1731_s0 = sld [smem:[#allocation16_spill]] }
  0x17   : > { %s1728_s30 = scalar_select %p1425_p11, 1, 0 }
  0x18   : > { %s1729_s6 = scalar_select %p1429_p12, 1, 0 }
  0x19   : > { %p939_p1 = pneg %p1433_p13 }
  0x1b   : > { %p940_p2 = pnand %p939_p1, %p1721_p4 }
  0x1c   : > { %s1086_s10 = scalar_lea.hbm %s1731_s0, 16 }
  0x1d   : > { %p1087_p0 = scmp.ne.s32.totalorder %s1731_s0, %s1086_s10  ;;  %p1088_p3 = pneg %p940_p2 }
  0x1e   : > { %p1093_p9 = scmp.lt.u32.totalorder %s1086_s10, %s1731_s0 }
  0x1f   : > { %p1089_p7 = pnand %p1088_p3, %p1087_p0 }
  0x21   : > { %p1090_p8 = pneg %p1089_p7 }
  0x23   : > { %p1095_p10 = pnand %p1093_p9, %p1090_p8 }
  0x25   : > { %1098 = shalt.err (!%p1095_p10)
}
  0x26   : > { %s1327_s15 = smov [#allocation2]   ;;  %p1720_p1 = scmp.ge.s32.totalorder %s1293_s21, 2 }
  0x27   : > { %942 = dma.hbm_to_smem (!%p940_p2), %s1731_s0, 16, %s1327_s15, [#allocation5]  }
  0x28   : > { %200 = sbr.rel (%p1720_p1) target bundleno = 162 (0xa2), region = 20 }
  0x2f   : > { %203 = sbr.rel (!%p1412_p5) target bundleno = 88 (0x58), region = 24  ;;  %s204_s23 = sand.u32 (%p1412_p5), 1, %s1289_s20  }
  0x30   : > { %s868_s25 = sshll.u32 (%p1412_p5), %s1293_s21, 1  ;;  %s867_s26 = sshll.u32 (%p1412_p5), %s204_s23, 4 }
  0x31   : > { %s210_s8 = ssub.s32 (%p1412_p5), 3, %s868_s25  ;;  %s1463_s11 = scalar_lea.sflag (%p1412_p5), [#allocation3], %s204_s23 }
  0x32   : > { %p211_p0 = scmp.lt.s32.totalorder (%p1412_p5), %s210_s8, 2  ;;  %s208_s12 = scalar_lea.vmem (%p1412_p5), [#allocation6], %s867_s26 }
  0x36   : > { %s1744_s8 = smov (!%p211_p0, %s210_s8), 2 }
  0x37   : > { %s1460_s9 = sshll.u32 %s1744_s8, 7 }
  0x38   : > { %s215_s10 = ssub.s32 256, %s1460_s9 }
  0x39   : > { %216 = vsyncadd %s1463_s11, %s215_s10  ;;  %p870_p2 = scmp.ne.s32.totalorder %s1460_s9, 0  ;;  %s922_s13 = sshll.u32 %s1293_s21, 10 }
  0x3a   : > { %s1732_s1 = sld [smem:[#allocation17_spill]]  ;;  %s222_s17 = sshll.u32 %s208_s12, 4  ;;  %s1473_s17 = int_to_ptr.vmem [resolvable:$true] %s222_s17 }
  0x40   : > { %s1471_s16 = scalar_lea.hbm %s1732_s1, %s922_s13  ;;  %s1103_s8 = scalar_lea.hbm %s1732_s1, 1536 }
  0x41   : > { %s1099_s23 = scalar_lea.hbm %s1471_s16, %s1460_s9  ;;  %p1104_p9 = scmp.lt.u32.totalorder %s1471_s16, %s1732_s1 }
  0x42   : > { %p1100_p3 = scmp.ne.s32.totalorder %s1471_s16, %s1099_s23  ;;  %p1105_p10 = scmp.lt.u32.totalorder %s1103_s8, %s1099_s23 }
  0x43   : > { %p1107_p1 = scmp.lt.u32.totalorder %s1099_s23, %s1471_s16 }
  0x44   : > { %p1101_p7 = pnand %p1100_p3, %p870_p2  ;;  %p1106_p0 = por %p1105_p10, %p1104_p9 }
  0x46   : > { %p1102_p8 = pneg %p1101_p7  ;;  %p1108_p4 = por %p1107_p1, %p1106_p0 }
  0x48   : > { %p1109_p12 = pnand %p1108_p4, %p1102_p8 }
  0x4a   : > { %1112 = shalt.err (!%p1109_p12)
}
  0x4b   : > { %s1113_s12 = scalar_lea.vmem %s1473_s17, %s1460_s9  ;;  %s1328_s13 = smov [#allocation6]  }
  0x4c   : > { %p1114_p3 = scmp.ne.s32.totalorder %s1473_s17, %s1113_s12  ;;  %s1117_s15 = sshll.u32 %s1328_s13, 4  ;;  %s1118_s15 = int_to_ptr.vmem [resolvable:$false] %s1117_s15 }
  0x4d   : > { %s1119_s25 = scalar_lea.vmem %s1118_s15, 512  ;;  %p1120_p6 = scmp.lt.s32.totalorder %s1473_s17, %s1118_s15 }
  0x4e   : > { %p1115_p7 = pnand %p1114_p3, %p870_p2  ;;  %p1121_p9 = scmp.lt.s32.totalorder %s1119_s25, %s1113_s12 }
  0x50   : > { %p1116_p11 = pneg %p1115_p7  ;;  %p1122_p10 = por %p1121_p9, %p1120_p6 }
  0x52   : > { %p1123_p1 = pnand %p1122_p10, %p1116_p11 }
  0x54   : > { %1126 = shalt.err (!%p1123_p1)
}
  0x55   : > { %s1329_s23 = smov 512   ;;  %s1330_s26 = smov 128  }
  0x56   : > { %s1331_s8 = smov 8  }
  0x57   : > { %228 = dma.hbm_to_vmem [thread:$0]  (%p870_p2), %s1471_s16, %s1460_s9, %s1473_s17, %s1463_s11, %s1329_s23, %s1330_s26, %s1331_s8  }
  0x58 PF: > { %231 = sbr.rel (!%p1412_p5) target bundleno = 125 (0x7d), region = 28  ;;  %s232_s10 = sand.u32 (%p1412_p5), 1, %s1293_s21  }
  0x59   : > { %s234_s14 = sand.u32 (%p1412_p5), 1, %s1289_s20   ;;  %s876_s13 = sshll.u32 (%p1412_p5), %s1293_s21, 1 }
  0x5a   : > { %s875_s12 = sshll.u32 (%p1412_p5), %s234_s14, 4  ;;  %s238_s15 = ssub.s32 (%p1412_p5), 3, %s876_s13 }
  0x5b   : > { %p239_p4 = scmp.lt.s32.totalorder (%p1412_p5), %s238_s15, 2  ;;  %s1508_s1 = scalar_lea.sflag (%p1412_p5), [#allocation8], %s232_s10 }
  0x5c   : > { %s236_s9 = scalar_lea.vmem (%p1412_p5), [#allocation7], %s875_s12 }
  0x5f   : > { %s1746_s15 = smov (!%p239_p4, %s238_s15), 2 }
  0x60   : > { %s1505_s25 = sshll.u32 %s1746_s15, 7 }
  0x61   : > { %s243_s0 = ssub.s32 256, %s1505_s25 }
  0x62   : > { %244 = vsyncadd %s1508_s1, %s243_s0  ;;  %p878_p6 = scmp.ne.s32.totalorder %s1505_s25, 0  ;;  %s923_s11 = sshll.u32 %s1293_s21, 10 }
  0x63   : > { %s705_s23 = scalar_lea.hbm %s1716_s2, %s923_s11  ;;  %s251_s26 = sshll.u32 %s236_s9, 4  ;;  %s1518_s26 = int_to_ptr.vmem [resolvable:$true] %s251_s26 }
  0x64   : > { %s1516_s8 = scalar_lea.hbm %s705_s23, 128  ;;  %s1155_s10 = scalar_lea.hbm %s705_s23, %s1505_s25 }
  0x65   : > { %s1156_s0 = scalar_lea.hbm %s1155_s10, 128  ;;  %s1131_s13 = scalar_lea.hbm %s1716_s2, 1536 }
  0x66   : > { %p1128_p11 = scmp.ne.s32.totalorder %s1516_s8, %s1156_s0  ;;  %p1132_p8 = scmp.lt.u32.totalorder %s1516_s8, %s1716_s2 }
  0x67   : > { %p1133_p0 = scmp.lt.u32.totalorder %s1131_s13, %s1156_s0  ;;  %p1135_p7 = scmp.lt.u32.totalorder %s1156_s0, %s1516_s8 }
  0x68   : > { %p1129_p12 = pnand %p1128_p11, %p878_p6 }
  0x69   : > { %p1134_p3 = por %p1133_p0, %p1132_p8 }
  0x6a   : > { %p1130_p2 = pneg %p1129_p12 }
  0x6b   : > { %p1136_p9 = por %p1135_p7, %p1134_p3 }
  0x6d   : > { %p1137_p10 = pnand %p1136_p9, %p1130_p2 }
  0x6f   : > { %1140 = shalt.err (!%p1137_p10)
}
  0x70   : > { %s1141_s9 = scalar_lea.vmem %s1518_s26, %s1505_s25  ;;  %s1332_s16 = smov [#allocation7]  }
  0x71   : > { %p1142_p1 = scmp.ne.s32.totalorder %s1518_s26, %s1141_s9  ;;  %s1145_s17 = sshll.u32 %s1332_s16, 4  ;;  %s1146_s17 = int_to_ptr.vmem [resolvable:$false] %s1145_s17 }
  0x72   : > { %s1147_s23 = scalar_lea.vmem %s1146_s17, 512  ;;  %p1148_p12 = scmp.lt.s32.totalorder %s1518_s26, %s1146_s17 }
  0x73   : > { %p1143_p4 = pnand %p1142_p1, %p878_p6  ;;  %p1149_p8 = scmp.lt.s32.totalorder %s1147_s23, %s1141_s9 }
  0x75   : > { %p1144_p11 = pneg %p1143_p4  ;;  %p1150_p0 = por %p1149_p8, %p1148_p12 }
  0x77   : > { %p1151_p3 = pnand %p1150_p0, %p1144_p11 }
  0x79   : > { %1154 = shalt.err (!%p1151_p3)
}
  0x7a   : > { %s1333_s10 = smov 512   ;;  %s1334_s0 = smov 128  }
  0x7b   : > { %s1335_s14 = smov 8  }
  0x7c   : > { %257 = dma.hbm_to_vmem [thread:$0]  (%p878_p6), %s1516_s8, %s1505_s25, %s1518_s26, %s1508_s1, %s1333_s10, %s1334_s0, %s1335_s14  }
  0x7d PF: > { %260 = sbr.rel (!%p1412_p5) target bundleno = 162 (0xa2), region = 32  ;;  %s261_s12 = sand.u32 (%p1412_p5), 1, %s1293_s21  }
  0x7e   : > { %s263_s13 = sand.u32 (%p1412_p5), 1, %s1289_s20   ;;  %s884_s11 = sshll.u32 (%p1412_p5), %s1293_s21, 1 }
  0x7f   : > { %s883_s15 = sshll.u32 (%p1412_p5), %s263_s13, 4  ;;  %s267_s9 = ssub.s32 (%p1412_p5), 3, %s884_s11 }
  0x80   : > { %p268_p2 = scmp.lt.s32.totalorder (%p1412_p5), %s267_s9, 2  ;;  %s1552_s23 = scalar_lea.sflag (%p1412_p5), [#allocation8], %s261_s12 }
  0x81   : > { %s265_s1 = scalar_lea.vmem (%p1412_p5), [#allocation9], %s883_s15 }
  0x84   : > { %s1748_s9 = smov (!%p268_p2, %s267_s9), 2 }
  0x85   : > { %s1549_s16 = sshll.u32 %s1748_s9, 7 }
  0x86   : > { %s272_s17 = ssub.s32 256, %s1549_s16 }
  0x87   : > { %273 = vsyncadd %s1552_s23, %s272_s17  ;;  %p886_p5 = scmp.ne.s32.totalorder %s1549_s16, 0  ;;  %s924_s28 = sshll.u32 %s1293_s21, 10 }
  0x88   : > { %s712_s8 = scalar_lea.hbm %s1717_s3, %s924_s28  ;;  %s280_s10 = sshll.u32 %s265_s1, 4  ;;  %s1562_s10 = int_to_ptr.vmem [resolvable:$true] %s280_s10 }
  0x89   : > { %s1560_s0 = scalar_lea.hbm %s712_s8, 384  ;;  %s1185_s14 = scalar_lea.hbm %s712_s8, %s1549_s16 }
  0x8a   : > { %s1186_s12 = scalar_lea.hbm %s1185_s14, 384  ;;  %s1161_s11 = scalar_lea.hbm %s1717_s3, 1536 }
  0x8b   : > { %p1158_p6 = scmp.ne.s32.totalorder %s1560_s0, %s1186_s12  ;;  %p1162_p10 = scmp.lt.u32.totalorder %s1560_s0, %s1717_s3 }
  0x8c   : > { %p1163_p1 = scmp.lt.u32.totalorder %s1161_s11, %s1186_s12  ;;  %p1165_p11 = scmp.lt.u32.totalorder %s1186_s12, %s1560_s0 }
  0x8d   : > { %p1159_p7 = pnand %p1158_p6, %p886_p5 }
  0x8e   : > { %p1164_p4 = por %p1163_p1, %p1162_p10 }
  0x8f   : > { %p1160_p9 = pneg %p1159_p7 }
  0x90   : > { %p1166_p12 = por %p1165_p11, %p1164_p4 }
  0x92   : > { %p1167_p8 = pnand %p1166_p12, %p1160_p9 }
  0x94   : > { %1170 = shalt.err (!%p1167_p8)
}
  0x95   : > { %s1171_s1 = scalar_lea.vmem %s1562_s10, %s1549_s16  ;;  %s1336_s28 = smov [#allocation9]  }
  0x96   : > { %p1172_p0 = scmp.ne.s32.totalorder %s1562_s10, %s1171_s1  ;;  %s1175_s25 = sshll.u32 %s1336_s28, 4  ;;  %s1176_s25 = int_to_ptr.vmem [resolvable:$false] %s1175_s25 }
  0x97   : > { %s1177_s26 = scalar_lea.vmem %s1176_s25, 512  ;;  %p1178_p6 = scmp.lt.s32.totalorder %s1562_s10, %s1176_s25 }
  0x98   : > { %p1173_p3 = pnand %p1172_p0, %p886_p5  ;;  %p1179_p7 = scmp.lt.s32.totalorder %s1177_s26, %s1171_s1 }
  0x9a   : > { %p1174_p2 = pneg %p1173_p3  ;;  %p1180_p10 = por %p1179_p7, %p1178_p6 }
  0x9c   : > { %p1181_p1 = pnand %p1180_p10, %p1174_p2 }
  0x9e   : > { %1184 = shalt.err (!%p1181_p1)
}
  0x9f   : > { %s1337_s8 = smov 512   ;;  %s1338_s14 = smov 128  }
  0xa0   : > { %s1339_s12 = smov 8  }
  0xa1   : > { %286 = dma.hbm_to_vmem [thread:$0]  (%p886_p5), %s1560_s0, %s1549_s16, %s1562_s10, %s1552_s23, %s1337_s8, %s1338_s14, %s1339_s12  }
  0xa2 PF: > { %292 = sbr.rel (%p1433_p13) target bundleno = 665 (0x299), region = 36  ;;  %p1733_p9 = scmp.eq.s32.totalorder (!%p1433_p13), %s1394_s22, 0 }
  0xa9   : > { %1264 = dma.done.wait (%p1733_p9), [#allocation5], 16   ;;  %p1734_p4 = pmov %p1733_p9 }
  0xaa   : > { %s1595_s13 = sand.u32 1, %s1285_s19   ;;  %p1735_p5 = scmp.ne.s32.totalorder %s1727_s29, 0 }
  0xab   : > { %1266 = vsyncadd (%p1734_p4), [#allocation5], 4294967280  ;;  %s1598_s15 = sshll.u32 %s1595_s13, 4  ;;  %s299_s16 = scalar_lea.sflag [#allocation3], %s1595_s13 }
  0xac   : > { %s302_s23 = scalar_lea.vmem [#allocation6], %s1598_s15 }
  0xad   : > { %1268 = dma.done.wait (%p1735_p5), %s299_s16, 256  }
  0xae   : > { %1270 = vsyncadd (%p1735_p5), %s299_s16, 4294967040  ;;  %s307_s7 = sand.u32 1, %s1394_s22   ;;  %s311_s0 = scalar_lea.vmem [#allocation7], %s1598_s15 }
  0xaf   : > { %s308_s10 = scalar_lea.sflag [#allocation8], %s307_s7 }
  0xb0   : > { %1272 = dma.done.wait (%p1735_p5), %s308_s10, 512  }
  0xb1   : > { %1274 = vsyncadd (%p1735_p5), %s308_s10, 4294966784  ;;  %s320_s11 = scalar_lea.vmem [#allocation9], %s1598_s15 }
  0xb2   : > { %325 = sfence }
  0xb3   : > { %v386_v0 = vld [vmem:[%s311_s0] sm:$0xff]  ;;  %v387_v2 = vld [vmem:[%s311_s0 + $0x8] sm:$0xff]  ;;  %s1613_s29 = sld [smem:[#allocation2]]  ;;  %s1615_s9 = sld [smem:[#allocation2 + $0x1]]  ;;  %vm505_vm1 = vcmask 7168   ;;  %v1340_v55 = vmov 0.0  }
  0xb4   : > { %v384_v1 = vld [vmem:[%s302_s23] sm:$0xff]  ;;  %v400_v3 = vmul.f32 %v386_v0, %v386_v0  ;;  %v385_v5 = vld [vmem:[%s302_s23 + $0x8] sm:$0xff]  ;;  %v401_v6 = vmul.f32 %v387_v2, %v387_v2  ;;  %v1341_v58 = vmov 0   ;;  %s1621_s17 = scalar_lea.vmem [#allocation11], %s1598_s15   ;;  %s901_s25 = sshll.u32 %s1394_s22, 4 }
  0xb5   : > { %v390_v4 = vmul.f32 %v384_v1, %v384_v1  ;;  %v391_v7 = vmul.f32 %v385_v5, %v385_v5  ;;  %v389_v8 = vld [vmem:[%s320_s11 + $0x8] sm:$0xff]  ;;  %v388_v9 = vld [vmem:[%s320_s11] sm:$0xff]  ;;  %v420_v12 = vmul.f32 %v386_v0, %v384_v1  ;;  %v421_v13 = vmul.f32 %v387_v2, %v385_v5  ;;  %s896_s26 = sshll.u32 %s1595_s13, 3  ;;  %s904_s12 = sshll.u32 %s1394_s22, 7 }
  0xb6   : > { %402 = vadd.xlane.f32.xlu1 %v400_v3  ;;  %v411_v10 = vmul.f32 %v389_v8, %v389_v8  ;;  %v410_v11 = vmul.f32 %v388_v9, %v388_v9  ;;  %v432_v14 = vmul.f32 %v388_v9, %v384_v1  ;;  %v433_v15 = vmul.f32 %v389_v8, %v385_v5  ;;  %s355_s8 = scalar_lea.vmem [#allocation10], %s896_s26  ;;  %s1640_s7 = scalar_lea.hbm %s1718_s4, %s904_s12 }
  0xb7   : > { %392 = vadd.xlane.f32.xlu0 %v390_v4  ;;  %s542_s14 = sshll.u32 %s355_s8, 4  ;;  %s525_s10 = scalar_lea.sflag [#allocation4], %s1595_s13  ;;  %s1635_s14 = int_to_ptr.vmem [resolvable:$true] %s542_s14 }
  0xb8   : > { %s1187_s0 = scalar_lea.vmem %s1635_s14, 128  ;;  %p1736_p8 = scmp.ne.s32.totalorder %s1728_s30, 0 }
  0xb9   : > { %v466_v52 = vstv %s1613_s29  ;;  %p446_p13 = scmp.eq.f32.partialorder %s1615_s9, 0.0  ;;  %p444_p11 = scmp.eq.f32.partialorder %s1613_s29, 0.0  ;;  %v469_v63 = vstv %s1615_s9 }
  0xba   : > { %404 = vadd.xlane.f32.xlu1 %v401_v6  ;;  %p1188_p12 = scmp.ne.s32.totalorder %s1635_s14, %s1187_s0  ;;  %s1342_s11 = smov [#allocation10]  }
  0xbb   : > { %394 = vadd.xlane.f32.xlu0 %v391_v7  ;;  %s447_s1 = scalar_select %p446_p13, 1.0, 0.0 }
  0xbc   : > { %s445_s28 = scalar_select %p444_p11, 1.0, 0.0 }
  0xbd   : > { %v459_v62 = vstv %s447_s1  ;;  %p1189_p0 = pnand %p1188_p12, %p1736_p8  ;;  %s1191_s29 = sshll.u32 %s1342_s11, 4  ;;  %s1192_s29 = int_to_ptr.vmem [resolvable:$false] %s1191_s29 }
  0xbe   : > { %414 = vadd.xlane.f32.xlu1 %v411_v10  ;;  %v456_v1 = vstv %s445_s28  ;;  %s1193_s9 = scalar_lea.vmem %s1192_s29, 256  ;;  %p1194_p2 = scmp.lt.s32.totalorder %s1635_s14, %s1192_s29 }
  0xbf   : > { %412 = vadd.xlane.f32.xlu0 %v410_v11  ;;  %p1190_p3 = pneg %p1189_p0  ;;  %p1195_p6 = scmp.lt.s32.totalorder %s1193_s9, %s1187_s0 }
  0xc1   : > { %p1196_p7 = por %p1195_p6, %p1194_p2 }
  0xc2   : > { %424 = vadd.xlane.f32.xlu1 %v421_v13 }
  0xc3   : > { %422 = vadd.xlane.f32.xlu0 %v420_v12  ;;  %p1197_p10 = pnand %p1196_p7, %p1190_p3 }
  0xc6   : > { %436 = vadd.xlane.f32.xlu1 %v433_v15 }
  0xc7   : > { %434 = vadd.xlane.f32.xlu0 %v432_v14 }
 0x143   : > { %v403_v16 = vpop.xlane.xlu1 %402 }
 0x144   : > { %v393_v17 = vpop.xlane.xlu0 %392  ;;  %v406_v19 = vmax.f32 %v403_v16, 1e-24 }
 0x145   : > { %v396_v18 = vmax.f32 %v393_v17, 1e-24 }
 0x147   : > { %1058 = vrsqrt.f32 %v396_v18  ;;  %v405_v20 = vpop.xlane.xlu1 %404 }
 0x148   : > { %v395_v21 = vpop.xlane.xlu0 %394  ;;  %1060 = vrsqrt.f32 %v406_v19  ;;  %v407_v23 = vmax.f32 %v405_v20, 1e-24  ;;  %v495_v20 = vlaneseq }
 0x149   : > { %v397_v22 = vmax.f32 %v395_v21, 1e-24 }
 0x14a   : > { %v496_v21 = vshrl.u32 %v495_v20, 7 }
 0x14b   : > { %1062 = vrsqrt.f32 %v397_v22  ;;  %v415_v24 = vpop.xlane.xlu1 %414 }
 0x14c   : > { %v413_v25 = vpop.xlane.xlu0 %412  ;;  %v417_v26 = vmax.f32 %v415_v24, 1e-24  ;;  %1064 = vrsqrt.f32 %v407_v23  ;;  %v497_v22 = vadd.s32 8, %v496_v21  ;;  %v498_v23 = vstv %s901_s25 }
 0x14d   : > { %v416_v27 = vmax.f32 %v413_v25, 1e-24  ;;  %v499_v25 = vadd.s32 %v498_v23, %v496_v21 }
 0x14e   : > { %1066 = vrsqrt.f32 %v417_v26 }
 0x14f   : > { %1068 = vrsqrt.f32 %v416_v27  ;;  %v425_v29 = vpop.xlane.xlu1 %424  ;;  %v500_v27 = vadd.s32 %v498_v23, %v497_v22  ;;  %vm501_vm5 = vcmp.lt.s32.totalorder %v499_v25, 20 }
 0x150   : > { %v423_v28 = vpop.xlane.xlu0 %422 }
 0x151   : > { %v1059_v30 = vpop.eup %1058  ;;  %vm502_vm6 = vcmp.lt.s32.totalorder %v500_v27, 20 }
 0x152   : > { %v426_v31 = vmul.f32 %v1059_v30, %v423_v28  ;;  %v1061_v32 = vpop.eup %1060 }
 0x153   : > { %v437_v34 = vpop.xlane.xlu1 %436 }
 0x154   : > { %v428_v33 = vmul.f32 %v1061_v32, %v426_v31  ;;  %v435_v36 = vpop.xlane.xlu0 %434 }
 0x155   : > { %v1063_v35 = vpop.eup %1062  ;;  %v438_v43 = vmul.f32 %v1059_v30, %v435_v36 }
 0x156   : > { %v430_v37 = vmul.f32 1.4285715, %v428_v33  ;;  %v427_v38 = vmul.f32 %v1063_v35, %v425_v29  ;;  %v1065_v39 = vpop.eup %1064  ;;  %v439_v40 = vmul.f32 %v1063_v35, %v437_v34 }
 0x158   : > { %v1067_v41 = vpop.eup %1066  ;;  %v429_v42 = vmul.f32 %v1065_v39, %v427_v38  ;;  %v448_v45 = vmul.f32 1.442695, %v430_v37 }
 0x159   : > { %v1069_v44 = vpop.eup %1068  ;;  %v441_v46 = vmul.f32 %v1067_v41, %v439_v40 }
 0x15a   : > { %v431_v47 = vmul.f32 1.4285715, %v429_v42  ;;  %v440_v48 = vmul.f32 %v1069_v44, %v438_v43  ;;  %1070 = vpow2.f32 %v448_v45 }
 0x15b   : > { %v443_v49 = vmul.f32 1.4285715, %v441_v46 }
 0x15c   : > { %v450_v50 = vmul.f32 1.442695, %v431_v47  ;;  %v442_v51 = vmul.f32 1.4285715, %v440_v48 }
 0x15d   : > { %v454_v53 = vmul.f32 1.442695, %v443_v49  ;;  %vm487_vm0 = vcmp.gt.f32.partialorder %v431_v47, %v443_v49 }
 0x15e   : > { %1072 = vpow2.f32 %v450_v50  ;;  %v452_v54 = vmul.f32 1.442695, %v442_v51  ;;  %vm486_vm2 = vcmp.gt.f32.partialorder %v430_v37, %v442_v51  ;;  %v900_v56 = vsel %vm487_vm0, 1.0, %v1340_v55 }
 0x15f   : > { %v899_v57 = vsel %vm486_vm2, 1.0, %v1340_v55  ;;  %1074 = vpow2.f32 %v454_v53  ;;  %vm493_vm3 = vcmp.eq.f32.partialorder %v900_v56, %v466_v52 }
 0x160   : > { %1076 = vpow2.f32 %v452_v54  ;;  %vm492_vm4 = vcmp.eq.f32.partialorder %v899_v57, %v466_v52  ;;  %v521_v59 = vsel %vm493_vm3, 1, %v1341_v58 }
 0x161   : > { %v520_v60 = vsel %vm492_vm4, 1, %v1341_v58  ;;  %523 = vst.msk [vmem:[%s1621_s17 + $0x8] sm:$0xff] %vm505_vm1, %v521_v59 }
 0x162   : > { %522 = vst.msk [vmem:[%s1621_s17] sm:$0xff] %vm505_vm1, %v520_v60 }
 0x164   : > { %v1071_v61 = vpop.eup %1070 }
 0x165   : > { %v457_v8 = vmul.f32 %v1071_v61, %v456_v1  ;;  %v467_v10 = vmul.f32 %v1071_v61, %v466_v52 }
 0x168   : > { %v1073_v0 = vpop.eup %1072 }
 0x169   : > { %v1075_v2 = vpop.eup %1074  ;;  %v458_v4 = vmul.f32 %v1073_v0, %v456_v1  ;;  %v468_v6 = vmul.f32 %v1073_v0, %v466_v52 }
 0x16a   : > { %v1077_v3 = vpop.eup %1076  ;;  %v461_v5 = vmul.f32 %v1075_v2, %v459_v62  ;;  %v471_v7 = vmul.f32 %v1075_v2, %v469_v63 }
 0x16b   : > { %v460_v9 = vmul.f32 %v1077_v3, %v459_v62  ;;  %v470_v11 = vmul.f32 %v1077_v3, %v469_v63 }
 0x16c   : > { %v463_v12 = vadd.f32 %v461_v5, %v458_v4  ;;  %v473_v13 = vadd.f32 %v471_v7, %v468_v6 }
 0x16d   : > { %v462_v14 = vadd.f32 %v460_v9, %v457_v8  ;;  %v472_v15 = vadd.f32 %v470_v11, %v467_v10 }
 0x16e   : > { %v465_v16 = vmax.f32 %v463_v12, 1e-08  ;;  %v475_v19 = vmax.f32 %v473_v13, 1e-08 }
 0x16f   : > { %v464_v17 = vmax.f32 %v462_v14, 1e-08  ;;  %v474_v18 = vmax.f32 %v472_v15, 1e-08 }
 0x170   : > { %1078 = vlog2.f32 %v465_v16 }
 0x171   : > { %1080 = vlog2.f32 %v464_v17 }
 0x172   : > { %1082 = vlog2.f32 %v474_v18 }
 0x173   : > { %1084 = vlog2.f32 %v475_v19 }
 0x17a   : > { %v1079_v24 = vpop.eup %1078 }
 0x17b   : > { %v1081_v26 = vpop.eup %1080  ;;  %v479_v30 = vmul.f32 0.6931472, %v1079_v24 }
 0x17c   : > { %v1083_v28 = vpop.eup %1082  ;;  %v477_v29 = vmul.f32 0.6931472, %v1081_v26 }
 0x17d   : > { %v1085_v31 = vpop.eup %1084  ;;  %v481_v32 = vmul.f32 0.6931472, %v1083_v28 }
 0x17e   : > { %v483_v33 = vmul.f32 0.6931472, %v1085_v31 }
 0x17f   : > { %v484_v34 = vsub.f32 %v477_v29, %v481_v32 }
 0x180   : > { %v485_v35 = vsub.f32 %v479_v30, %v483_v33 }
 0x181   : > { %v503_v36 = vsel %vm501_vm5, %v484_v34, 0.0 }
 0x182   : > { %v504_v37 = vsel %vm502_vm6, %v485_v35, 0.0  ;;  %v506_v38 = vsel %vm505_vm1, %v503_v36, 0.0 }
 0x183   : > { %v507_v39 = vsel %vm505_vm1, %v504_v37, 0.0 }
 0x184   : > { %v508_v40 = vadd.f32 %v507_v39, %v506_v38 }
 0x186   : > { %509 = vadd.xlane.f32.xlu0 %v508_v40 }
 0x213   : > { %v510_v41 = vpop.xlane.xlu0 %509 }
 0x214   : > { %v511_v42 = vrot.slane %v510_v41, 4 }
 0x216   : > { %v512_v43 = vadd.f32 %v511_v42, %v510_v41 }
 0x218   : > { %v513_v44 = vrot.slane %v512_v43, 2 }
 0x21a   : > { %v514_v45 = vadd.f32 %v513_v44, %v512_v43 }
 0x21c   : > { %v515_v46 = vrot.slane %v514_v45, 1 }
 0x21e   : > { %v516_v47 = vadd.f32 %v515_v46, %v514_v45 }
 0x220   : > { %928 = vpush %v516_v47 }
 0x251   : > { %s929_s15 = spop %928 }
 0x252   : > { %v518_v48 = vstv %s929_s15 }
 0x253   : > { %519 = vst [vmem:[%s355_s8] sm:$0xff] %v518_v48 }
 0x254   : > { %1200 = shalt.err (!%p1197_p10)
}
 0x255   : > { %s1201_s13 = scalar_lea.hbm %s1640_s7, 128  ;;  %s1205_s26 = scalar_lea.hbm %s1718_s4, 256 }
 0x256   : > { %p1202_p1 = scmp.ne.s32.totalorder %s1640_s7, %s1201_s13  ;;  %p1206_p5 = scmp.lt.u32.totalorder %s1640_s7, %s1718_s4 }
 0x257   : > { %p1207_p13 = scmp.lt.u32.totalorder %s1205_s26, %s1201_s13  ;;  %p1209_p12 = scmp.lt.u32.totalorder %s1201_s13, %s1640_s7 }
 0x258   : > { %p1203_p9 = pnand %p1202_p1, %p1736_p8 }
 0x259   : > { %p1208_p11 = por %p1207_p13, %p1206_p5 }
 0x25a   : > { %p1204_p4 = pneg %p1203_p9 }
 0x25b   : > { %p1210_p0 = por %p1209_p12, %p1208_p11 }
 0x25d   : > { %p1211_p3 = pnand %p1210_p0, %p1204_p4 }
 0x25f   : > { %1214 = shalt.err (!%p1211_p3)
}
 0x260   : > { %937 = dma.vmem_to_hbm [thread:$0]  (%p1736_p8), %s1635_s14, 128, %s1640_s7, %s525_s10  }
 0x261   : > { %548 = sbr.rel (!%p1736_p8) target bundleno = 665 (0x299), region = 60  ;;  %s905_s15 = sshll.u32 (%p1736_p8), %s1394_s22, 1 }
 0x262   : > { %s1672_s0 = scalar_lea.vmem (%p1736_p8), %s1719_s5, %s901_s25   ;;  %s550_s11 = ssub.s32 (%p1736_p8), 3, %s905_s15 }
 0x263   : > { %p551_p2 = scmp.lt.s32.totalorder (%p1736_p8), %s550_s11, 2 }
 0x268   : > { %s1750_s11 = smov (!%p551_p2, %s550_s11), 2 }
 0x269   : > { %s906_s29 = sshll.u32 %s1750_s11, 7 }
 0x26a   : > { %p909_p6 = scmp.eq.s32.totalorder %s906_s29, 0 }
 0x26b   : > { %s1678_s30 = sshrl.u32 (!%p909_p6), %s1750_s11, 1 }
 0x26c   : > { %559 = sbr.rel (%p909_p6) target bundleno = 665 (0x299), region = 64  ;;  %p910_p8 = scmp.le.s32.totalorder (!%p909_p6), %s1678_s30, 0 }
 0x273   : > { %780 = sbr.rel (%p910_p8) target bundleno = 644 (0x284), region = 176  ;;  %s1295_s22 = smov (!%p910_p8), %s1672_s0  }
 0x274   : > { %s1299_s14 = smov (!%p910_p8), %s1621_s17   ;;  %s1303_s25 = smov (!%p910_p8), 0  }
 0x275   : > { %s1307_s7 = smov (!%p910_p8), 0  }
 0x27a LB: >> { %v623_v49 = vld [vmem:[%s1301_s14] sm:$0xff]  ;;  %v625_v50 = vld [vmem:[%s1301_s14 + $0x8] sm:$0xff]  ;;  %s627_s10 = sadd.s32 1, %s1305_s25  ;;  %s617_s7 = sadd.s32 1, %s1309_s7   ;;  %s1309_s7 = sphi %s1307_s7, %s617_s7   ;;  %s1305_s25 = sphi %s1303_s25, %s1304_s25   ;;  %s1301_s14 = sphi %s1299_s14, %s632_s14   ;;  %s1297_s22 = sphi %s1295_s22, %s633_s22  }
 0x27b   : >> { %624 = vst [vmem:[%s1297_s22] sm:$0xff] %v623_v49  ;;  %626 = vst [vmem:[%s1297_s22 + $0x8] sm:$0xff] %v625_v50  ;;  %p628_p7 = scmp.ge.s32.totalorder %s627_s10, %s1678_s30  ;;  %p616_p10 = scmp.ge.s32.totalorder %s617_s7, %s1678_s30 }
 0x27d   : >> { %s1752_s10 = smov (%p628_p7, %s627_s10), 0  ;;  %619 = sbr.rel (!%p616_p10) target bundleno = 634 (0x27a), region = 182 }
 0x27e   : >> { %s911_s9 = sshll.u32 %s1752_s10, 4  ;;  %s1304_s25 = smov %s1752_s10  }
 0x27f   : >> { %s632_s14 = scalar_lea.vmem %s1621_s17, %s911_s9 [#allocation11]   ;;  %s633_s22 = scalar_lea.vmem %s1672_s0, %s911_s9  }
 0x284 PF: > { %s1688_s13 = sand.u32 1, %s1750_s11   ;;  %s926_s1 = sshll.u32 %s1678_s30, 4 }
 0x285   : > { %s638_s28 = scalar_lea.vmem %s1621_s17, %s926_s1 [#allocation11]   ;;  %s640_s26 = scalar_lea.vmem %s1672_s0, %s926_s1  }
 0x286   : > { %p916_p1 = scmp.le.s32.totalorder %s1688_s13, 0 }
 0x287   : > { %s1311_s8 = smov (!%p916_p1), %s640_s26   ;;  %s1315_s12 = smov (!%p916_p1), %s638_s28  }
 0x288   : > { %794 = sbr.rel (%p916_p1) target bundleno = 665 (0x299), region = 187  ;;  %s1319_s15 = smov (!%p916_p1), 0  }
 0x289   : > { %s1323_s16 = smov (!%p916_p1), 0  }
 0x28f LB: >> { %v650_v51 = vld [vmem:[%s1317_s12] sm:$0xff]  ;;  %s652_s23 = sadd.s32 1, %s1321_s15  ;;  %s644_s16 = sadd.s32 1, %s1325_s16   ;;  %s1325_s16 = sphi %s1323_s16, %s644_s16   ;;  %s1321_s15 = sphi %s1319_s15, %s1320_s15   ;;  %s1317_s12 = sphi %s1315_s12, %s657_s12   ;;  %s1313_s8 = sphi %s1311_s8, %s658_s8  }
 0x290   : >> { %651 = vst [vmem:[%s1313_s8] sm:$0xff] %v650_v51  ;;  %p653_p9 = scmp.ge.s32.totalorder %s652_s23, %s1688_s13  ;;  %p643_p4 = scmp.ge.s32.totalorder %s644_s16, %s1688_s13 }
 0x292   : >> { %s1754_s23 = smov (%p653_p9, %s652_s23), 0  ;;  %646 = sbr.rel (!%p643_p4) target bundleno = 655 (0x28f), region = 193 }
 0x293   : >> { %s917_s17 = sshll.u32 %s1754_s23, 3  ;;  %s1320_s15 = smov %s1754_s23  }
 0x294   : >> { %s657_s12 = scalar_lea.vmem %s638_s28, %s917_s17 [#allocation11]   ;;  %s658_s8 = scalar_lea.vmem %s640_s26, %s917_s17  }
 0x299 PF: > { %s670_s0 = sand.u32 1, %s1281_s18   ;;  %p1737_p5 = scmp.ne.s32.totalorder %s1729_s6, 0 }
 0x29a   : > { %p1738_p13 = scmp.ge.s32.totalorder %s1293_s21, 2  ;;  %s671_s11 = scalar_lea.sflag [#allocation4], %s670_s0 }
 0x29c   : > { %p944_p11 = pnand %p1738_p13, %p1737_p5 }
 0x29e   : > { %1276 = dma.done.wait (!%p944_p11), %s671_s11, 128  }
 0x29f   : > { %1278 = vsyncadd (!%p944_p11), %s671_s11, 4294967168  ;;  %p23_p12 = scmp.ge.s32.totalorder %s1398_s24, 4   ;;  %s1739_s18 = smov %s1285_s19 }
 0x2a0   : > { %s1740_s19 = smov %s1289_s20  ;;  %s1741_s20 = smov %s1410_s27 }
 0x2a1   : > { %s1742_s21 = smov %s1398_s24  ;;  %25 = sbr.rel (!%p23_p12) target bundleno = 11 (0xb), region = 204 }
 0x2a8   :  { %683 = vsyncpa [#allocation3], 1 }
 0x2a9   :  { %685 = vsyncpa [#allocation3 + $0x1], 1 }
 0x2aa   :  { %686 = vsyncpa [#allocation8], 1 }
 0x2ab   :  { %688 = vsyncpa [#allocation8 + $0x1], 1 }
 0x2ac   :  { %689 = vsyncpa [#allocation4], 1 }
 0x2ad   :  { %691 = vsyncpa [#allocation4 + $0x1], 1 }
 0x2ae   :  { %692 = vsyncpa [#allocation5], 1 }
 0x2af   :  { %694 = vsyncpa [#allocation5 + $0x1], 1 }

</bundles_post_ra>
